<compile_context>
chip_gen: v7x
topology: tpu7x:2x2x1
jax: 0.10.0
libtpu: 0.0.40
codegen_flags: <defaults>
</compile_context>

<pallas_src>
import jax
import jax.numpy as jnp
from jax.experimental import pallas as pl
from jax.experimental.pallas import tpu as pltpu


def correction_fn(expansion_ratio: float, d_model: int) -> int:
    return int((expansion_ratio * d_model + 255) // 256 * 256)


def _round_up(a: int, b: int) -> int:
    return (a + b - 1) // b * b


def _vmem_capacity_bytes() -> int:
    try:
        return int(pltpu.get_tpu_info().vmem_capacity_bytes)
    except Exception:
        return 64 * 1024 * 1024  # conservative fallback (v7x per-TC VMEM)


# ----------------------------- kernels --------------------------------------

def mlp_kernel_acc(x_ref, wup_ref, wdown_ref, o_ref, acc_ref):
    """C-tiled body: persistent f32 accumulator over the reduction (C) axis.

    x_ref:     (tm, H)   tile of flattened tokens
    wup_ref:   (H, tc)   C-tile of up-projection weight (transposed)
    wdown_ref: (tc, H)   C-tile of down-projection weight (transposed)
    o_ref:     (tm, H)
    acc_ref:   (tm, H)   f32 accumulator, resident across the C axis
    """
    c = pl.program_id(1)

    @pl.when(c == 0)
    def _():
        acc_ref[...] = jnp.zeros_like(acc_ref)

    x = x_ref[...]
    # up projection (MXU), f32 accumulate
    h = jnp.dot(x, wup_ref[...], preferred_element_type=jnp.float32)
    # relu then square (VPU, kept in f32 -- v5e has no bf16 VPU path)
    h = jnp.maximum(h, 0.0)
    h = h * h
    # partial down projection over this C tile (MXU), f32 accumulate
    acc_ref[...] += jnp.dot(h.astype(x.dtype), wdown_ref[...],
                            preferred_element_type=jnp.float32)

    @pl.when(c == pl.num_programs(1) - 1)
    def _():
        o_ref[...] = acc_ref[...].astype(o_ref.dtype)


def mlp_kernel_fused(x_ref, wup_ref, wdown_ref, o_ref):
    """Fast path (whole C resident): no accumulator scratch, single write."""
    x = x_ref[...]
    h = jnp.dot(x, wup_ref[...], preferred_element_type=jnp.float32)
    h = jnp.maximum(h, 0.0)
    h = h * h
    o_ref[...] = jnp.dot(h.astype(x.dtype), wdown_ref[...],
                         preferred_element_type=jnp.float32).astype(o_ref.dtype)


# ----------------------------- wrapper ---------------------------------------

def prepare_mlp_weights(w_up, w_down, compute_dtype):
    """One-time weight prep (hoisted out of the forward path).

    w_up:   (C, H)  PyTorch Linear layout (out_features, in_features)
    w_down: (H, C)
    Returns (H_pad, C) and (C, H_pad) arrays in `compute_dtype`, with the
    hidden dim padded to a multiple of 128 (lane-dense loads/stores).
    Pass jnp.bfloat16 as compute_dtype for the MXU-native fast path
    (accuracy/perf tradeoff; accumulation stays f32 either way).
    """
    C, H = w_up.shape
    assert w_down.shape == (H, C)
    Hp = _round_up(H, 128)
    w_up_t = jnp.transpose(w_up).astype(compute_dtype)      # (H, C)
    w_down_t = jnp.transpose(w_down).astype(compute_dtype)  # (C, H)
    if Hp != H:
        # zero-padded hidden rows/cols contribute nothing / are sliced off
        w_up_t = jnp.pad(w_up_t, ((0, Hp - H), (0, 0)))
        w_down_t = jnp.pad(w_down_t, ((0, 0), (0, Hp - H)))
    return w_up_t, w_down_t


def _select_tiles(M, H, C, dt_bytes, tm, tc, vmem_cap):
    """Pick (tm, tc) so the double-buffered working set fits this chip's VMEM.

    Weight HBM traffic scales with the number of M tiles, so prefer the
    largest tm that fits; at a given tm prefer whole-C (enables the
    no-accumulator fast path), else 256-wide C tiles.
    """
    budget = int(vmem_cap * 0.6)

    def working_set(tm_, tc_):
        return (4 * tm_ * H * dt_bytes      # x + out tiles, double-buffered
                + 4 * H * tc_ * dt_bytes    # wup + wdown tiles, double-buffered
                + tm_ * H * 4               # f32 accumulator scratch
                + tm_ * tc_ * 4)            # f32 intermediate h

    # tm floor of 128 MXU rows; never overshoot what M needs.
    tm_cap = max(128, _round_up(M, 128))
    if tm is not None:
        tm_cands = [min(max(128, _round_up(tm, 8)), tm_cap)]
    else:
        tm_cands = sorted({t for t in (1024, 512, 256, 128, tm_cap)
                           if t <= min(tm_cap, 1024)}, reverse=True)

    if tc is not None and C % tc == 0:
        tc_cands = [tc]
    elif C % 256 == 0 and C != 256:
        tc_cands = [C, 256]
    else:
        tc_cands = [C]

    for tm_ in tm_cands:
        for tc_ in tc_cands:
            if working_set(tm_, tc_) <= budget:
                return tm_, tc_
    return tm_cands[-1], tc_cands[-1]


def mlp_forward(x, w_up_t, w_down_t, *, tm=None, tc=None):
    """x: (batch, seq, hidden). w_up_t: (H_pad, C), w_down_t: (C, H_pad) from
    `prepare_mlp_weights`.  Output matches x's dtype/shape."""
    B, S, H = x.shape
    Hp, C = w_up_t.shape
    assert w_down_t.shape == (C, Hp) and Hp % 128 == 0 and Hp >= H
    M = B * S
    out_dtype = x.dtype
    cdt = w_up_t.dtype                      # compute dtype (matches prepare)
    dtb = jnp.dtype(cdt).itemsize

    vmem_cap = _vmem_capacity_bytes()
    tm_eff, tc_eff = _select_tiles(M, Hp, C, dtb, tm, tc, vmem_cap)
    n_c = C // tc_eff
    M_pad = _round_up(M, tm_eff)
    grid_m = M_pad // tm_eff

    x2d = x.reshape(M, H)
    if x2d.dtype != cdt:
        x2d = x2d.astype(cdt)
    if M_pad != M or Hp != H:
        x2d = jnp.pad(x2d, ((0, M_pad - M), (0, Hp - H)))

    # VMEM limit: actual working set with headroom, capped by physical VMEM.
    ws = (4 * tm_eff * Hp * dtb + 4 * Hp * tc_eff * dtb
          + tm_eff * Hp * 4 + tm_eff * tc_eff * 4)
    vmem_limit = int(min(max(ws * 2, 32 * 1024 * 1024), int(vmem_cap * 0.9)))

    # Weights are re-streamed once per M tile (block index resets along c).
    cost = pl.CostEstimate(
        flops=4 * M_pad * Hp * C,                       # up + down matmuls
        transcendentals=0,
        bytes_accessed=(2 * M_pad * Hp * dtb            # x in + out
                        + grid_m * 2 * Hp * C * dtb),   # both weights per M tile
    )

    if n_c == 1:
        # Fast path: whole C resident -> no accumulator / revisit writes.
        out2d = pl.pallas_call(
            mlp_kernel_fused,
            out_shape=jax.ShapeDtypeStruct((M_pad, Hp), out_dtype),
            grid_spec=pltpu.PrefetchScalarGridSpec(
                num_scalar_prefetch=0,
                grid=(grid_m,),
                in_specs=[
                    pl.BlockSpec((tm_eff, Hp), lambda i: (i, 0)),
                    pl.BlockSpec((Hp, C), lambda i: (0, 0)),
                    pl.BlockSpec((C, Hp), lambda i: (0, 0)),
                ],
                out_specs=pl.BlockSpec((tm_eff, Hp), lambda i: (i, 0)),
            ),
            compiler_params=pltpu.CompilerParams(
                dimension_semantics=("parallel",),
                vmem_limit_bytes=vmem_limit,
            ),
            cost_estimate=cost,
        )(x2d, w_up_t, w_down_t)
    else:
        out2d = pl.pallas_call(
            mlp_kernel_acc,
            out_shape=jax.ShapeDtypeStruct((M_pad, Hp), out_dtype),
            grid_spec=pltpu.PrefetchScalarGridSpec(
                num_scalar_prefetch=0,
                grid=(grid_m, n_c),
                in_specs=[
                    pl.BlockSpec((tm_eff, Hp), lambda i, c: (i, 0)),
                    pl.BlockSpec((Hp, tc_eff), lambda i, c: (0, c)),
                    pl.BlockSpec((tc_eff, Hp), lambda i, c: (c, 0)),
                ],
                out_specs=pl.BlockSpec((tm_eff, Hp), lambda i, c: (i, 0)),
                scratch_shapes=[pltpu.VMEM((tm_eff, Hp), jnp.float32)],
            ),
            compiler_params=pltpu.CompilerParams(
                dimension_semantics=("parallel", "arbitrary"),
                vmem_limit_bytes=vmem_limit,
            ),
            cost_estimate=cost,
        )(x2d, w_up_t, w_down_t)

    return out2d[:M, :H].reshape(B, S, H)


if __name__ == "__main__":
    # config: hidden_size=128, expansion_ratio=2.0 -> corrected_dim=256
    hidden_size = 128
    expansion_ratio = 2.0
    corrected_dim = correction_fn(expansion_ratio, hidden_size)  # 256

    batch, seq = 2, 8

    key = jax.random.PRNGKey(0)
    kx, ku, kd = jax.random.split(key, 3)
    x = jax.random.normal(kx, (batch, seq, hidden_size), dtype=jnp.float32)
    # PyTorch Linear weight layout: (out_features, in_features)
    w_up = jax.random.normal(ku, (corrected_dim, hidden_size),
                             dtype=jnp.float32) * 0.05
    w_down = jax.random.normal(kd, (hidden_size, corrected_dim),
                               dtype=jnp.float32) * 0.05

    # One-time weight prep (transpose + cast + pad), hoisted out of forward.
    w_up_t, w_down_t = prepare_mlp_weights(w_up, w_down, x.dtype)

    fwd = jax.jit(mlp_forward)
    out = jax.block_until_ready(fwd(x, w_up_t, w_down_t))

    # pure-JAX reference of the exact PyTorch forward
    h_ref = jnp.maximum(x @ w_up.T, 0.0) ** 2
    ref = h_ref @ w_down.T

    assert out.shape == (batch, seq, hidden_size)
    assert jnp.allclose(out, ref, atol=1e-4, rtol=1e-4), "mismatch vs reference"

    print("KERNEL_OK")
</pallas_src>

<mosaic_0001>
module attributes {stable_mosaic.version = 11 : i64} {
  func.func @mlp_kernel_fused(%arg0: i32, %arg1: memref<128x128xf32, #tpu.memory_space<vmem>>, %arg2: memref<128x256xf32, #tpu.memory_space<vmem>>, %arg3: memref<256x128xf32, #tpu.memory_space<vmem>>, %arg4: memref<128x128xf32, #tpu.memory_space<vmem>>) attributes {dimension_semantics = [#tpu.dimension_semantics<parallel>], iteration_bounds = array<i64: 1>, scalar_prefetch = 0 : i64, scratch_operands = 0 : i64, tpu.core_type = #tpu.core_type<tc>, window_params = [{transform_indices = @transform_0, window_bounds = array<i64: 128, 128>}, {pipeline_mode = #tpu.pipeline_mode<synchronous>, transform_indices = @transform_1, window_bounds = array<i64: 128, 256>}, {pipeline_mode = #tpu.pipeline_mode<synchronous>, transform_indices = @transform_2, window_bounds = array<i64: 256, 128>}, {transform_indices = @transform_3, window_bounds = array<i64: 128, 128>}]} {
    %c0 = arith.constant 0 : index
    %c0_0 = arith.constant 0 : index
    %0 = vector.load %arg1[%c0, %c0_0] : memref<128x128xf32, #tpu.memory_space<vmem>>, vector<128x128xf32>
    %c0_1 = arith.constant 0 : index
    %c0_2 = arith.constant 0 : index
    %1 = vector.load %arg2[%c0_1, %c0_2] : memref<128x256xf32, #tpu.memory_space<vmem>>, vector<128x256xf32>
    %cst = arith.constant dense<0.000000e+00> : vector<128x256xf32>
    %2 = tpu.matmul %0, %1, %cst {dimension_numbers = #tpu.dot_dimension_numbers<[1], [0], [0], [1], [0, 0, 1, 1], [], []>} : vector<128x128xf32>, vector<128x256xf32>, vector<128x256xf32> -> vector<128x256xf32>
    %cst_3 = arith.constant 0.000000e+00 : f32
    %3 = vector.broadcast %cst_3 : f32 to vector<128x256xf32>
    %4 = arith.maximumf %2, %3 : vector<128x256xf32>
    %5 = arith.mulf %4, %4 : vector<128x256xf32>
    %c0_4 = arith.constant 0 : index
    %c0_5 = arith.constant 0 : index
    %6 = vector.load %arg3[%c0_4, %c0_5] : memref<256x128xf32, #tpu.memory_space<vmem>>, vector<256x128xf32>
    %cst_6 = arith.constant dense<0.000000e+00> : vector<128x128xf32>
    %7 = tpu.matmul %5, %6, %cst_6 {dimension_numbers = #tpu.dot_dimension_numbers<[1], [0], [0], [1], [0, 0, 1, 1], [], []>} : vector<128x256xf32>, vector<256x128xf32>, vector<128x128xf32> -> vector<128x128xf32>
    %c0_7 = arith.constant 0 : index
    %c0_8 = arith.constant 0 : index
    %8 = vector.load %arg4[%c0_7, %c0_8] : memref<128x128xf32, #tpu.memory_space<vmem>>, vector<128x128xf32>
    tpu.vector_store %arg4[%c0_7, %c0_8], %7 {strides = array<i32>} : memref<128x128xf32, #tpu.memory_space<vmem>>, vector<128x128xf32>,
    return
  }
  func.func @transform_0(%arg0: i32) -> (i32, i32) {
    %c0_i32 = arith.constant 0 : i32
    %c0_i32_0 = arith.constant 0 : i32
    return %arg0, %c0_i32 : i32, i32
  }
  func.func @transform_1(%arg0: i32) -> (i32, i32) {
    %c0_i32 = arith.constant 0 : i32
    %c0_i32_0 = arith.constant 0 : i32
    %c0_i32_1 = arith.constant 0 : i32
    return %c0_i32, %c0_i32_0 : i32, i32
  }
  func.func @transform_2(%arg0: i32) -> (i32, i32) {
    %c0_i32 = arith.constant 0 : i32
    %c0_i32_0 = arith.constant 0 : i32
    %c0_i32_1 = arith.constant 0 : i32
    return %c0_i32, %c0_i32_0 : i32, i32
  }
  func.func @transform_3(%arg0: i32) -> (i32, i32) {
    %c0_i32 = arith.constant 0 : i32
    %c0_i32_0 = arith.constant 0 : i32
    return %arg0, %c0_i32 : i32, i32
  }
}

</mosaic_0001>

<bundles_post_ra>
// kernel: mlp_forward.1
= control target key start
LH: loop header
LB: loop body
LE: loop exit
PB: predicated region body
PF: predicated region fallthrough
CT: control target
= control target key end

     0   :  { %8 = vsyncpa [#allocation3], 0  ;;  %s876_s0 = inlined_call_operand.vmem [shape: f32[128,128], index: 0, kind: input, shape index: {}]   ;;  %s877_s1 = inlined_call_operand.hbm [shape: f32[128,256], index: 1, kind: input, shape index: {}]   ;;  %s878_s2 = inlined_call_operand.hbm [shape: f32[256,128], index: 2, kind: input, shape index: {}]   ;;  %s879_s3 = inlined_call_operand.vmem [shape: f32[128,128], index: 3, kind: output, shape index: {}]  }
   0x1   :  { %9 = vsyncpa [#allocation5], 0  ;;  %s713_s12 = smov [#allocation2]   ;;  %s665_s16 = scalar_lea.hbm %s877_s1, 4096 }
   0x2   :  { %s17_s13 = sshll.u32 %s713_s12, 4  ;;  %p666_p0 = scmp.ne.s32.totalorder %s877_s1, %s665_s16  ;;  %s18_s13 = int_to_ptr.vmem [resolvable:$true] %s17_s13 }
   0x3   :  { %p669_p1 = scmp.lt.u32.totalorder %s665_s16, %s877_s1 }
   0x5   :  { %p671_p2 = pnand %p669_p1, %p666_p0 }
   0x7   :  { %674 = shalt.err (!%p671_p2)
}
   0x8   :  { %s675_s21 = scalar_lea.vmem %s18_s13, 4096  ;;  %p680_p4 = scmp.lt.s32.totalorder %s18_s13, %s18_s13 }
   0x9   :  { %p676_p3 = scmp.ne.s32.totalorder %s18_s13, %s675_s21  ;;  %p681_p5 = scmp.lt.s32.totalorder %s675_s21, %s675_s21 }
   0xb   :  { %p682_p6 = por %p681_p5, %p680_p4 }
   0xd   :  { %p683_p7 = pnand %p682_p6, %p676_p3 }
   0xf   :  { %686 = shalt.err (!%p683_p7)
}
  0x10   :  { %s714_s22 = smov 256   ;;  %s715_s23 = smov 16  }
  0x11   :  { %23 = dma.hbm_to_vmem [thread:$0]  %s877_s1, 4096, %s18_s13, [#allocation3], %s714_s22, %s714_s22, %s715_s23  }
  0x12   :  { %s716_s26 = smov [#allocation4]   ;;  %s687_s30 = scalar_lea.hbm %s878_s2, 4096 }
  0x13   :  { %s29_s27 = sshll.u32 %s716_s26, 4  ;;  %p688_p8 = scmp.ne.s32.totalorder %s878_s2, %s687_s30  ;;  %s30_s27 = int_to_ptr.vmem [resolvable:$true] %s29_s27 }
  0x14   :  { %p691_p9 = scmp.lt.u32.totalorder %s687_s30, %s878_s2 }
  0x16   :  { %p693_p10 = pnand %p691_p9, %p688_p8 }
  0x18   :  { %696 = shalt.err (!%p693_p10)
}
  0x19   :  { %s697_s8 = scalar_lea.vmem %s30_s27, 4096  ;;  %p702_p12 = scmp.lt.s32.totalorder %s30_s27, %s30_s27 }
  0x1a   :  { %p698_p11 = scmp.ne.s32.totalorder %s30_s27, %s697_s8  ;;  %p703_p13 = scmp.lt.s32.totalorder %s697_s8, %s697_s8 }
  0x1c   :  { %p704_p0 = por %p703_p13, %p702_p12 }
  0x1e   :  { %p705_p1 = pnand %p704_p0, %p698_p11 }
  0x20   :  { %708 = shalt.err (!%p705_p1)
}
  0x21   :  { %s717_s1 = smov 128   ;;  %s718_s9 = smov 8  }
  0x22   :  { %35 = dma.hbm_to_vmem [thread:$0]  %s878_s2, 4096, %s30_s27, [#allocation5], %s717_s1, %s717_s1, %s718_s9  }
  0x23   :  { %709 = dma.done.wait [#allocation3], 4096  }
  0x24   :  { %710 = vsyncadd [#allocation3], 4294963200 }
  0x25   :  { %711 = dma.done.wait [#allocation5], 4096  }
  0x26   :  { %712 = vsyncadd [#allocation5], 4294963200  ;;  %v719_v0 = vmov 0.0   ;;  %v59_v1 = vld [vmem:[#allocation2 + $0x8] sm:$0xff]  ;;  %v61_v2 = vld [vmem:[#allocation2 + $0x18] sm:$0xff] }
  0x27   :  { %154 = vmatprep.mubr.f32.mxu0 %v719_v0  ;;  %v58_v3 = vld [vmem:[#allocation2] sm:$0xff]  ;;  %v594_v4 = vpack.c.bf16 %v61_v2, %v59_v1  ;;  %v60_v5 = vld [vmem:[#allocation2 + $0x10] sm:$0xff]  ;;  %v63_v6 = vld [vmem:[#allocation2 + $0x28] sm:$0xff] }
  0x28   :  { %v65_v7 = vld [vmem:[#allocation2 + $0x38] sm:$0xff]  ;;  %v596_v8 = vpack.c.bf16 %v60_v5, %v58_v3  ;;  %v62_v10 = vld [vmem:[#allocation2 + $0x20] sm:$0xff]  ;;  %v64_v11 = vld [vmem:[#allocation2 + $0x30] sm:$0xff] }
  0x29   :  { %v598_v9 = vpack.c.bf16 %v65_v7, %v63_v6  ;;  %v67_v12 = vld [vmem:[#allocation2 + $0x48] sm:$0xff]  ;;  %595 = vmatprep.subr.bf16.mxu0 %v594_v4  ;;  %v69_v13 = vld [vmem:[#allocation2 + $0x58] sm:$0xff]  ;;  %v600_v14 = vpack.c.bf16 %v64_v11, %v62_v10  ;;  %v66_v16 = vld [vmem:[#allocation2 + $0x40] sm:$0xff] }
  0x2a   :  { %597 = vmatpush1.bf16.msra.mxu0 %v596_v8  ;;  %v602_v15 = vpack.c.bf16 %v69_v13, %v67_v12  ;;  %v68_v17 = vld [vmem:[#allocation2 + $0x50] sm:$0xff]  ;;  %v71_v18 = vld [vmem:[#allocation2 + $0x68] sm:$0xff]  ;;  %v73_v19 = vld [vmem:[#allocation2 + $0x78] sm:$0xff] }
  0x2b   :  { %599 = vmatprep.subr.bf16.mxu0 %v598_v9  ;;  %v604_v20 = vpack.c.bf16 %v68_v17, %v66_v16  ;;  %v606_v21 = vpack.c.bf16 %v73_v19, %v71_v18  ;;  %v70_v22 = vld [vmem:[#allocation2 + $0x60] sm:$0xff]  ;;  %v72_v23 = vld [vmem:[#allocation2 + $0x70] sm:$0xff]  ;;  %v75_v24 = vld [vmem:[#allocation2 + $0x88] sm:$0xff] }
  0x2c   :  { %v77_v25 = vld [vmem:[#allocation2 + $0x98] sm:$0xff]  ;;  %v608_v26 = vpack.c.bf16 %v72_v23, %v70_v22  ;;  %v74_v28 = vld [vmem:[#allocation2 + $0x80] sm:$0xff]  ;;  %v76_v29 = vld [vmem:[#allocation2 + $0x90] sm:$0xff] }
  0x2d   :  { %v610_v27 = vpack.c.bf16 %v77_v25, %v75_v24  ;;  %v79_v30 = vld [vmem:[#allocation2 + $0xa8] sm:$0xff]  ;;  %v81_v31 = vld [vmem:[#allocation2 + $0xb8] sm:$0xff]  ;;  %v78_v32 = vld [vmem:[#allocation2 + $0xa0] sm:$0xff]  ;;  %v612_v34 = vpack.c.bf16 %v76_v29, %v74_v28 }
  0x2e   :  { %601 = vmatpush1.bf16.msra.mxu0 %v600_v14  ;;  %v80_v33 = vld [vmem:[#allocation2 + $0xb0] sm:$0xff]  ;;  %v83_v35 = vld [vmem:[#allocation2 + $0xc8] sm:$0xff]  ;;  %v85_v36 = vld [vmem:[#allocation2 + $0xd8] sm:$0xff]  ;;  %v614_v40 = vpack.c.bf16 %v81_v31, %v79_v30 }
  0x2f   :  { %603 = vmatprep.subr.bf16.mxu0 %v602_v15  ;;  %v331_v37 = vld [vmem:[#allocation4 + $0x80] sm:$0xff]  ;;  %v332_v38 = vld [vmem:[#allocation4 + $0x88] sm:$0xff]  ;;  %v333_v43 = vld [vmem:[#allocation4 + $0x90] sm:$0xff]  ;;  %v616_v51 = vpack.c.bf16 %v80_v33, %v78_v32  ;;  %v618_v55 = vpack.c.bf16 %v85_v36, %v83_v35 }
  0x30   :  { %v315_v39 = vld [vmem:[#allocation4] sm:$0xff]  ;;  %v626_v41 = vpack.c.bf16 %v332_v38, %v331_v37  ;;  %v316_v42 = vld [vmem:[#allocation4 + $0x8] sm:$0xff]  ;;  %v334_v44 = vld [vmem:[#allocation4 + $0x98] sm:$0xff] }
  0x31   :  { %v628_v45 = vpack.c.bf16 %v316_v42, %v315_v39  ;;  %v630_v46 = vpack.c.bf16 %v334_v44, %v333_v43  ;;  %v317_v47 = vld [vmem:[#allocation4 + $0x10] sm:$0xff]  ;;  %v318_v48 = vld [vmem:[#allocation4 + $0x18] sm:$0xff]  ;;  %v335_v49 = vld [vmem:[#allocation4 + $0xa0] sm:$0xff] }
  0x32   :  { %605 = vmatpush1.bf16.msra.mxu0 %v604_v20  ;;  %627 = vmatprep.subr.bf16.mxu1 %v626_v41  ;;  %v336_v50 = vld [vmem:[#allocation4 + $0xa8] sm:$0xff]  ;;  %v82_v52 = vld [vmem:[#allocation2 + $0xc0] sm:$0xff]  ;;  %v84_v53 = vld [vmem:[#allocation2 + $0xd0] sm:$0xff]  ;;  %v632_v54 = vpack.c.bf16 %v318_v48, %v317_v47 }
  0x33   :  { %607 = vmatprep.subr.bf16.mxu0 %v606_v21  ;;  %629 = vmatpush3.bf16.msra.mxu1 %v628_v45  ;;  %v87_v56 = vld [vmem:[#allocation2 + $0xe8] sm:$0xff]  ;;  %v634_v57 = vpack.c.bf16 %v336_v50, %v335_v49  ;;  %v319_v58 = vld [vmem:[#allocation4 + $0x20] sm:$0xff]  ;;  %v89_v60 = vld [vmem:[#allocation2 + $0xf8] sm:$0xff]  ;;  %v620_v63 = vpack.c.bf16 %v84_v53, %v82_v52 }
  0x34   :  { %631 = vmatprep.subr.bf16.mxu1 %v630_v46  ;;  %v320_v59 = vld [vmem:[#allocation4 + $0x28] sm:$0xff]  ;;  %v337_v61 = vld [vmem:[#allocation4 + $0xb0] sm:$0xff]  ;;  %v338_v62 = vld [vmem:[#allocation4 + $0xb8] sm:$0xff]  ;;  %v622_v3 = vpack.c.bf16 %v89_v60, %v87_v56 }
  0x35   :  { %v86_v1 = vld [vmem:[#allocation2 + $0xe0] sm:$0xff]  ;;  %v636_v2 = vpack.c.bf16 %v320_v59, %v319_v58  ;;  %v88_v4 = vld [vmem:[#allocation2 + $0xf0] sm:$0xff]  ;;  %v638_v5 = vpack.c.bf16 %v338_v62, %v337_v61  ;;  %v322_v7 = vld [vmem:[#allocation4 + $0x38] sm:$0xff] }
  0x36   :  { %609 = vmatpush1.bf16.msra.mxu0 %v608_v26  ;;  %v321_v6 = vld [vmem:[#allocation4 + $0x30] sm:$0xff]  ;;  %v339_v8 = vld [vmem:[#allocation4 + $0xc0] sm:$0xff]  ;;  %v340_v9 = vld [vmem:[#allocation4 + $0xc8] sm:$0xff]  ;;  %v624_v10 = vpack.c.bf16 %v88_v4, %v86_v1 }
  0x37   :  { %611 = vmatprep.subr.bf16.mxu0 %v610_v27  ;;  %633 = vmatpush3.bf16.msra.mxu1 %v632_v54  ;;  %v640_v11 = vpack.c.bf16 %v322_v7, %v321_v6  ;;  %v642_v12 = vpack.c.bf16 %v340_v9, %v339_v8  ;;  %v323_v13 = vld [vmem:[#allocation4 + $0x40] sm:$0xff]  ;;  %v324_v14 = vld [vmem:[#allocation4 + $0x48] sm:$0xff]  ;;  %v341_v15 = vld [vmem:[#allocation4 + $0xd0] sm:$0xff] }
  0x38   :  { %635 = vmatprep.subr.bf16.mxu1 %v634_v57  ;;  %v342_v16 = vld [vmem:[#allocation4 + $0xd8] sm:$0xff]  ;;  %v42_v17 = vld [vmem:[%s876_s0] sm:$0xff]  ;;  %v644_v18 = vpack.c.bf16 %v324_v14, %v323_v13  ;;  %v325_v20 = vld [vmem:[#allocation4 + $0x50] sm:$0xff] }
  0x39   :  { %v646_v19 = vpack.c.bf16 %v342_v16, %v341_v15  ;;  %v326_v21 = vld [vmem:[#allocation4 + $0x58] sm:$0xff]  ;;  %v343_v22 = vld [vmem:[#allocation4 + $0xe0] sm:$0xff]  ;;  %v344_v23 = vld [vmem:[#allocation4 + $0xe8] sm:$0xff] }
  0x3a   :  { %613 = vmatpush1.bf16.msra.mxu0 %v612_v34  ;;  %v43_v24 = vld [vmem:[%s876_s0 + $0x8] sm:$0xff]  ;;  %v648_v25 = vpack.c.bf16 %v326_v21, %v325_v20  ;;  %v650_v26 = vpack.c.bf16 %v344_v23, %v343_v22  ;;  %v44_v27 = vld [vmem:[%s876_s0 + $0x10] sm:$0xff]  ;;  %v45_v28 = vld [vmem:[%s876_s0 + $0x18] sm:$0xff] }
  0x3b   :  { %615 = vmatprep.subr.bf16.mxu0 %v614_v40  ;;  %637 = vmatpush3.bf16.msra.mxu1 %v636_v2  ;;  %v46_v29 = vld [vmem:[%s876_s0 + $0x20] sm:$0xff]  ;;  %v47_v30 = vld [vmem:[%s876_s0 + $0x28] sm:$0xff]  ;;  %v48_v31 = vld [vmem:[%s876_s0 + $0x30] sm:$0xff] }
  0x3c   :  { %639 = vmatprep.subr.bf16.mxu1 %v638_v5  ;;  %v49_v32 = vld [vmem:[%s876_s0 + $0x38] sm:$0xff]  ;;  %v50_v33 = vld [vmem:[%s876_s0 + $0x40] sm:$0xff]  ;;  %v51_v34 = vld [vmem:[%s876_s0 + $0x48] sm:$0xff] }
  0x3d   :  { %v52_v35 = vld [vmem:[%s876_s0 + $0x50] sm:$0xff]  ;;  %v53_v36 = vld [vmem:[%s876_s0 + $0x58] sm:$0xff]  ;;  %v54_v37 = vld [vmem:[%s876_s0 + $0x60] sm:$0xff] }
  0x3e   :  { %617 = vmatpush1.bf16.msra.mxu0 %v616_v51  ;;  %v55_v38 = vld [vmem:[%s876_s0 + $0x68] sm:$0xff]  ;;  %v56_v39 = vld [vmem:[%s876_s0 + $0x70] sm:$0xff]  ;;  %v57_v40 = vld [vmem:[%s876_s0 + $0x78] sm:$0xff] }
  0x3f   :  { %619 = vmatprep.subr.bf16.mxu0 %v618_v55  ;;  %641 = vmatpush3.bf16.msra.mxu1 %v640_v11  ;;  %v327_v41 = vld [vmem:[#allocation4 + $0x60] sm:$0xff]  ;;  %v328_v42 = vld [vmem:[#allocation4 + $0x68] sm:$0xff]  ;;  %v345_v44 = vld [vmem:[#allocation4 + $0xf0] sm:$0xff] }
  0x40   :  { %643 = vmatprep.subr.bf16.mxu1 %v642_v12  ;;  %v652_v43 = vpack.c.bf16 %v328_v42, %v327_v41  ;;  %v346_v45 = vld [vmem:[#allocation4 + $0xf8] sm:$0xff]  ;;  %v329_v47 = vld [vmem:[#allocation4 + $0x70] sm:$0xff] }
  0x41   :  { %v654_v46 = vpack.c.bf16 %v346_v45, %v345_v44  ;;  %v330_v48 = vld [vmem:[#allocation4 + $0x78] sm:$0xff] }
  0x42   :  { %621 = vmatpush1.bf16.msra.mxu0 %v620_v63  ;;  %v656_v49 = vpack.c.bf16 %v330_v48, %v329_v47 }
  0x43   :  { %623 = vmatprep.subr.bf16.mxu0 %v622_v3  ;;  %645 = vmatpush3.bf16.msra.mxu1 %v644_v18 }
  0x44   :  { %647 = vmatprep.subr.bf16.mxu1 %v646_v19 }
  0x46   :  { %625 = vmatpush1.bf16.msra.mxu0 %v624_v10 }
  0x47   :  { %649 = vmatpush3.bf16.msra.mxu1 %v648_v25 }
  0x48   :  { %651 = vmatprep.subr.bf16.mxu1 %v650_v26 }
  0x49   :  { %155 = vmatmul.mubr.f32.vlgmr.msra.gmra.mrb[0].mxu0 %v42_v17 }
  0x4a   :  { %160 = vmatprep.mubr.f32.mxu0 %v719_v0 }
  0x4b   :  { %653 = vmatpush3.bf16.msra.mxu1 %v652_v43 }
  0x4c   :  { %655 = vmatprep.subr.bf16.mxu1 %v654_v46 }
  0x4d   :  { %161 = vmatmul.mubr.f32.gmra.mrb[2].mxu0 %v43_v24 }
  0x4e   :  { %166 = vmatprep.mubr.f32.mxu0 %v719_v0 }
  0x4f   :  { %657 = vmatpush3.bf16.msra.mxu1 %v656_v49 }
  0x51   :  { %167 = vmatmul.mubr.f32.gmra.mrb[4].mxu0 %v44_v27 }
  0x52   :  { %172 = vmatprep.mubr.f32.mxu0 %v719_v0 }
  0x55   :  { %173 = vmatmul.mubr.f32.gmra.mrb[6].mxu0 %v45_v28 }
  0x56   :  { %178 = vmatprep.mubr.f32.mxu0 %v719_v0 }
  0x59   :  { %179 = vmatmul.mubr.f32.gmra.mrb[8].mxu0 %v46_v29 }
  0x5a   :  { %184 = vmatprep.mubr.f32.mxu0 %v719_v0 }
  0x5d   :  { %185 = vmatmul.mubr.f32.gmra.mrb[10].mxu0 %v47_v30 }
  0x5e   :  { %190 = vmatprep.mubr.f32.mxu0 %v719_v0 }
  0x61   :  { %191 = vmatmul.mubr.f32.gmra.mrb[12].mxu0 %v48_v31 }
  0x62   :  { %196 = vmatprep.mubr.f32.mxu0 %v719_v0 }
  0x65   :  { %197 = vmatmul.mubr.f32.gmra.mrb[14].mxu0 %v49_v32 }
  0x66   :  { %202 = vmatprep.mubr.f32.mxu0 %v719_v0 }
  0x69   :  { %203 = vmatmul.mubr.f32.gmra.mrb[16].mxu0 %v50_v33 }
  0x6a   :  { %208 = vmatprep.mubr.f32.mxu0 %v719_v0 }
  0x6d   :  { %209 = vmatmul.mubr.f32.gmra.mrb[18].mxu0 %v51_v34 }
  0x6e   :  { %214 = vmatprep.mubr.f32.mxu0 %v719_v0 }
  0x71   :  { %215 = vmatmul.mubr.f32.gmra.mrb[20].mxu0 %v52_v35 }
  0x72   :  { %220 = vmatprep.mubr.f32.mxu0 %v719_v0 }
  0x75   :  { %221 = vmatmul.mubr.f32.gmra.mrb[22].mxu0 %v53_v36 }
  0x76   :  { %226 = vmatprep.mubr.f32.mxu0 %v719_v0 }
  0x79   :  { %227 = vmatmul.mubr.f32.gmra.mrb[24].mxu0 %v54_v37 }
  0x7a   :  { %232 = vmatprep.mubr.f32.mxu0 %v719_v0 }
  0x7d   :  { %233 = vmatmul.mubr.f32.gmra.mrb[26].mxu0 %v55_v38 }
  0x7e   :  { %238 = vmatprep.mubr.f32.mxu0 %v719_v0 }
  0x81   :  { %239 = vmatmul.mubr.f32.gmra.mrb[28].mxu0 %v56_v39 }
  0x82   :  { %244 = vmatprep.mubr.f32.mxu0 %v719_v0 }
  0x85   :  { %245 = vmatmul.mubr.f32.gmra.mrb[30].mxu0 %v57_v40 }
 0x11c   :  { %v156_v50 = vpop.f32.mrb[0].mxu0 }
 0x11d   :  { %v251_v51 = vmax.f32 %v156_v50, 0.0  ;;  %v158_v0 = vpop.f32.mrb[1].mxu0 }
 0x11e   :  { %v252_v52 = vmax.f32 %v158_v0, 0.0 }
 0x11f   :  { %v283_v55 = vmul.f32 %v251_v51, %v251_v51 }
 0x120   :  { %v162_v53 = vpop.f32.mrb[2].mxu0  ;;  %v284_v54 = vmul.f32 %v252_v52, %v252_v52 }
 0x121   :  { %v253_v56 = vmax.f32 %v162_v53, 0.0  ;;  %v164_v57 = vpop.f32.mrb[3].mxu0 }
 0x122   :  { %v254_v58 = vmax.f32 %v164_v57, 0.0  ;;  %411 = vmatprep.mubr.f32.mxu1 %v284_v54 }
 0x123   :  { %412 = vmatmul.mubr.f32.vlgmr.msra.gmra.mrb[0].mxu1 %v283_v55  ;;  %v285_v61 = vmul.f32 %v253_v56, %v253_v56 }
 0x124   :  { %v286_v59 = vmul.f32 %v254_v58, %v254_v58  ;;  %v168_v60 = vpop.f32.mrb[4].mxu0 }
 0x125   :  { %v255_v62 = vmax.f32 %v168_v60, 0.0  ;;  %v170_v63 = vpop.f32.mrb[5].mxu0 }
 0x126   :  { %v256_v1 = vmax.f32 %v170_v63, 0.0  ;;  %416 = vmatprep.mubr.f32.mxu1 %v286_v59 }
 0x127   :  { %417 = vmatmul.mubr.f32.gmra.mrb[2].mxu1 %v285_v61  ;;  %v287_v4 = vmul.f32 %v255_v62, %v255_v62 }
 0x128   :  { %v288_v2 = vmul.f32 %v256_v1, %v256_v1  ;;  %v174_v3 = vpop.f32.mrb[6].mxu0 }
 0x129   :  { %v257_v5 = vmax.f32 %v174_v3, 0.0  ;;  %v176_v6 = vpop.f32.mrb[7].mxu0 }
 0x12a   :  { %v258_v7 = vmax.f32 %v176_v6, 0.0  ;;  %421 = vmatprep.mubr.f32.mxu1 %v288_v2 }
 0x12b   :  { %422 = vmatmul.mubr.f32.gmra.mrb[4].mxu1 %v287_v4  ;;  %v289_v10 = vmul.f32 %v257_v5, %v257_v5 }
 0x12c   :  { %v290_v8 = vmul.f32 %v258_v7, %v258_v7  ;;  %v180_v9 = vpop.f32.mrb[8].mxu0 }
 0x12d   :  { %v259_v11 = vmax.f32 %v180_v9, 0.0  ;;  %v182_v12 = vpop.f32.mrb[9].mxu0 }
 0x12e   :  { %v260_v13 = vmax.f32 %v182_v12, 0.0  ;;  %426 = vmatprep.mubr.f32.mxu1 %v290_v8 }
 0x12f   :  { %427 = vmatmul.mubr.f32.gmra.mrb[6].mxu1 %v289_v10  ;;  %v291_v16 = vmul.f32 %v259_v11, %v259_v11 }
 0x130   :  { %v292_v14 = vmul.f32 %v260_v13, %v260_v13  ;;  %v186_v15 = vpop.f32.mrb[10].mxu0 }
 0x131   :  { %v261_v17 = vmax.f32 %v186_v15, 0.0  ;;  %v188_v18 = vpop.f32.mrb[11].mxu0 }
 0x132   :  { %v262_v19 = vmax.f32 %v188_v18, 0.0  ;;  %431 = vmatprep.mubr.f32.mxu1 %v292_v14 }
 0x133   :  { %432 = vmatmul.mubr.f32.gmra.mrb[8].mxu1 %v291_v16  ;;  %v293_v22 = vmul.f32 %v261_v17, %v261_v17 }
 0x134   :  { %v294_v20 = vmul.f32 %v262_v19, %v262_v19  ;;  %v192_v21 = vpop.f32.mrb[12].mxu0 }
 0x135   :  { %v263_v23 = vmax.f32 %v192_v21, 0.0  ;;  %v194_v24 = vpop.f32.mrb[13].mxu0 }
 0x136   :  { %v264_v25 = vmax.f32 %v194_v24, 0.0  ;;  %436 = vmatprep.mubr.f32.mxu1 %v294_v20 }
 0x137   :  { %437 = vmatmul.mubr.f32.gmra.mrb[10].mxu1 %v293_v22  ;;  %v295_v28 = vmul.f32 %v263_v23, %v263_v23 }
 0x138   :  { %v296_v26 = vmul.f32 %v264_v25, %v264_v25  ;;  %v198_v27 = vpop.f32.mrb[14].mxu0 }
 0x139   :  { %v265_v29 = vmax.f32 %v198_v27, 0.0  ;;  %v200_v30 = vpop.f32.mrb[15].mxu0 }
 0x13a   :  { %v266_v31 = vmax.f32 %v200_v30, 0.0  ;;  %441 = vmatprep.mubr.f32.mxu1 %v296_v26 }
 0x13b   :  { %442 = vmatmul.mubr.f32.gmra.mrb[12].mxu1 %v295_v28  ;;  %v297_v34 = vmul.f32 %v265_v29, %v265_v29 }
 0x13c   :  { %v298_v32 = vmul.f32 %v266_v31, %v266_v31  ;;  %v204_v33 = vpop.f32.mrb[16].mxu0 }
 0x13d   :  { %v267_v35 = vmax.f32 %v204_v33, 0.0  ;;  %v206_v36 = vpop.f32.mrb[17].mxu0 }
 0x13e   :  { %v268_v37 = vmax.f32 %v206_v36, 0.0  ;;  %446 = vmatprep.mubr.f32.mxu1 %v298_v32 }
 0x13f   :  { %447 = vmatmul.mubr.f32.gmra.mrb[14].mxu1 %v297_v34  ;;  %v299_v40 = vmul.f32 %v267_v35, %v267_v35 }
 0x140   :  { %v300_v38 = vmul.f32 %v268_v37, %v268_v37  ;;  %v210_v39 = vpop.f32.mrb[18].mxu0 }
 0x141   :  { %v269_v41 = vmax.f32 %v210_v39, 0.0  ;;  %v212_v42 = vpop.f32.mrb[19].mxu0 }
 0x142   :  { %v270_v43 = vmax.f32 %v212_v42, 0.0  ;;  %451 = vmatprep.mubr.f32.mxu1 %v300_v38 }
 0x143   :  { %452 = vmatmul.mubr.f32.gmra.mrb[16].mxu1 %v299_v40  ;;  %v301_v46 = vmul.f32 %v269_v41, %v269_v41 }
 0x144   :  { %v302_v44 = vmul.f32 %v270_v43, %v270_v43  ;;  %v216_v45 = vpop.f32.mrb[20].mxu0 }
 0x145   :  { %v271_v47 = vmax.f32 %v216_v45, 0.0  ;;  %v218_v48 = vpop.f32.mrb[21].mxu0 }
 0x146   :  { %v272_v49 = vmax.f32 %v218_v48, 0.0  ;;  %456 = vmatprep.mubr.f32.mxu1 %v302_v44 }
 0x147   :  { %457 = vmatmul.mubr.f32.gmra.mrb[18].mxu1 %v301_v46  ;;  %v303_v0 = vmul.f32 %v271_v47, %v271_v47 }
 0x148   :  { %v304_v50 = vmul.f32 %v272_v49, %v272_v49  ;;  %v222_v51 = vpop.f32.mrb[22].mxu0 }
 0x149   :  { %v273_v52 = vmax.f32 %v222_v51, 0.0  ;;  %v224_v53 = vpop.f32.mrb[23].mxu0 }
 0x14a   :  { %v274_v54 = vmax.f32 %v224_v53, 0.0  ;;  %461 = vmatprep.mubr.f32.mxu1 %v304_v50 }
 0x14b   :  { %462 = vmatmul.mubr.f32.gmra.mrb[20].mxu1 %v303_v0  ;;  %v305_v57 = vmul.f32 %v273_v52, %v273_v52 }
 0x14c   :  { %v306_v55 = vmul.f32 %v274_v54, %v274_v54  ;;  %v228_v56 = vpop.f32.mrb[24].mxu0 }
 0x14d   :  { %v275_v58 = vmax.f32 %v228_v56, 0.0  ;;  %v230_v59 = vpop.f32.mrb[25].mxu0 }
 0x14e   :  { %v276_v60 = vmax.f32 %v230_v59, 0.0  ;;  %466 = vmatprep.mubr.f32.mxu1 %v306_v55 }
 0x14f   :  { %467 = vmatmul.mubr.f32.gmra.mrb[22].mxu1 %v305_v57  ;;  %v307_v63 = vmul.f32 %v275_v58, %v275_v58 }
 0x150   :  { %v308_v61 = vmul.f32 %v276_v60, %v276_v60  ;;  %v234_v62 = vpop.f32.mrb[26].mxu0 }
 0x151   :  { %v277_v1 = vmax.f32 %v234_v62, 0.0  ;;  %v236_v2 = vpop.f32.mrb[27].mxu0 }
 0x152   :  { %v278_v3 = vmax.f32 %v236_v2, 0.0  ;;  %471 = vmatprep.mubr.f32.mxu1 %v308_v61 }
 0x153   :  { %472 = vmatmul.mubr.f32.gmra.mrb[24].mxu1 %v307_v63  ;;  %v309_v6 = vmul.f32 %v277_v1, %v277_v1 }
 0x154   :  { %v310_v4 = vmul.f32 %v278_v3, %v278_v3  ;;  %v240_v5 = vpop.f32.mrb[28].mxu0 }
 0x155   :  { %v279_v7 = vmax.f32 %v240_v5, 0.0  ;;  %v242_v8 = vpop.f32.mrb[29].mxu0 }
 0x156   :  { %v280_v9 = vmax.f32 %v242_v8, 0.0  ;;  %476 = vmatprep.mubr.f32.mxu1 %v310_v4 }
 0x157   :  { %477 = vmatmul.mubr.f32.gmra.mrb[26].mxu1 %v309_v6  ;;  %v311_v12 = vmul.f32 %v279_v7, %v279_v7 }
 0x158   :  { %v312_v10 = vmul.f32 %v280_v9, %v280_v9  ;;  %v246_v11 = vpop.f32.mrb[30].mxu0 }
 0x159   :  { %v281_v13 = vmax.f32 %v246_v11, 0.0  ;;  %v248_v14 = vpop.f32.mrb[31].mxu0 }
 0x15a   :  { %v282_v15 = vmax.f32 %v248_v14, 0.0  ;;  %481 = vmatprep.mubr.f32.mxu1 %v312_v10 }
 0x15b   :  { %482 = vmatmul.mubr.f32.gmra.mrb[28].mxu1 %v311_v12  ;;  %v313_v17 = vmul.f32 %v281_v13, %v281_v13 }
 0x15c   :  { %v314_v16 = vmul.f32 %v282_v15, %v282_v15 }
 0x15e   :  { %486 = vmatprep.mubr.f32.mxu1 %v314_v16 }
 0x15f   :  { %487 = vmatmul.mubr.f32.gmra.mrb[30].mxu1 %v313_v17 }
 0x1f6   :  { %v546_v18 = vpop.f32.mrb[0].mxu1 }
 0x1f7   :  { %v547_v19 = vpop.f32.mrb[1].mxu1 }
 0x1f8   :  { %v548_v20 = vadd.f32 %v547_v19, %v546_v18 }
 0x1fa   :  { %492 = vst [vmem:[%s879_s3] sm:$0xff] %v548_v20  ;;  %v549_v21 = vpop.f32.mrb[2].mxu1 }
 0x1fb   :  { %v550_v22 = vpop.f32.mrb[3].mxu1 }
 0x1fc   :  { %v551_v23 = vadd.f32 %v550_v22, %v549_v21 }
 0x1fe   :  { %493 = vst [vmem:[%s879_s3 + $0x8] sm:$0xff] %v551_v23  ;;  %v552_v24 = vpop.f32.mrb[4].mxu1 }
 0x1ff   :  { %v553_v25 = vpop.f32.mrb[5].mxu1 }
 0x200   :  { %v554_v26 = vadd.f32 %v553_v25, %v552_v24 }
 0x202   :  { %494 = vst [vmem:[%s879_s3 + $0x10] sm:$0xff] %v554_v26  ;;  %v555_v27 = vpop.f32.mrb[6].mxu1 }
 0x203   :  { %v556_v28 = vpop.f32.mrb[7].mxu1 }
 0x204   :  { %v557_v29 = vadd.f32 %v556_v28, %v555_v27 }
 0x206   :  { %495 = vst [vmem:[%s879_s3 + $0x18] sm:$0xff] %v557_v29  ;;  %v558_v30 = vpop.f32.mrb[8].mxu1 }
 0x207   :  { %v559_v31 = vpop.f32.mrb[9].mxu1 }
 0x208   :  { %v560_v32 = vadd.f32 %v559_v31, %v558_v30 }
 0x20a   :  { %496 = vst [vmem:[%s879_s3 + $0x20] sm:$0xff] %v560_v32  ;;  %v561_v33 = vpop.f32.mrb[10].mxu1 }
 0x20b   :  { %v562_v34 = vpop.f32.mrb[11].mxu1 }
 0x20c   :  { %v563_v35 = vadd.f32 %v562_v34, %v561_v33 }
 0x20e   :  { %497 = vst [vmem:[%s879_s3 + $0x28] sm:$0xff] %v563_v35  ;;  %v564_v36 = vpop.f32.mrb[12].mxu1 }
 0x20f   :  { %v565_v37 = vpop.f32.mrb[13].mxu1 }
 0x210   :  { %v566_v38 = vadd.f32 %v565_v37, %v564_v36 }
 0x212   :  { %498 = vst [vmem:[%s879_s3 + $0x30] sm:$0xff] %v566_v38  ;;  %v567_v39 = vpop.f32.mrb[14].mxu1 }
 0x213   :  { %v568_v40 = vpop.f32.mrb[15].mxu1 }
 0x214   :  { %v569_v41 = vadd.f32 %v568_v40, %v567_v39 }
 0x216   :  { %499 = vst [vmem:[%s879_s3 + $0x38] sm:$0xff] %v569_v41  ;;  %v570_v42 = vpop.f32.mrb[16].mxu1 }
 0x217   :  { %v571_v43 = vpop.f32.mrb[17].mxu1 }
 0x218   :  { %v572_v44 = vadd.f32 %v571_v43, %v570_v42 }
 0x21a   :  { %500 = vst [vmem:[%s879_s3 + $0x40] sm:$0xff] %v572_v44  ;;  %v573_v45 = vpop.f32.mrb[18].mxu1 }
 0x21b   :  { %v574_v46 = vpop.f32.mrb[19].mxu1 }
 0x21c   :  { %v575_v47 = vadd.f32 %v574_v46, %v573_v45 }
 0x21e   :  { %501 = vst [vmem:[%s879_s3 + $0x48] sm:$0xff] %v575_v47  ;;  %v576_v48 = vpop.f32.mrb[20].mxu1 }
 0x21f   :  { %v577_v49 = vpop.f32.mrb[21].mxu1 }
 0x220   :  { %v578_v50 = vadd.f32 %v577_v49, %v576_v48 }
 0x222   :  { %502 = vst [vmem:[%s879_s3 + $0x50] sm:$0xff] %v578_v50  ;;  %v579_v51 = vpop.f32.mrb[22].mxu1 }
 0x223   :  { %v580_v0 = vpop.f32.mrb[23].mxu1 }
 0x224   :  { %v581_v52 = vadd.f32 %v580_v0, %v579_v51 }
 0x226   :  { %503 = vst [vmem:[%s879_s3 + $0x58] sm:$0xff] %v581_v52  ;;  %v582_v53 = vpop.f32.mrb[24].mxu1 }
 0x227   :  { %v583_v54 = vpop.f32.mrb[25].mxu1 }
 0x228   :  { %v584_v55 = vadd.f32 %v583_v54, %v582_v53 }
 0x22a   :  { %504 = vst [vmem:[%s879_s3 + $0x60] sm:$0xff] %v584_v55  ;;  %v585_v56 = vpop.f32.mrb[26].mxu1 }
 0x22b   :  { %v586_v57 = vpop.f32.mrb[27].mxu1 }
 0x22c   :  { %v587_v58 = vadd.f32 %v586_v57, %v585_v56 }
 0x22e   :  { %505 = vst [vmem:[%s879_s3 + $0x68] sm:$0xff] %v587_v58  ;;  %v588_v59 = vpop.f32.mrb[28].mxu1 }
 0x22f   :  { %v589_v60 = vpop.f32.mrb[29].mxu1 }
 0x230   :  { %v590_v61 = vadd.f32 %v589_v60, %v588_v59 }
 0x232   :  { %506 = vst [vmem:[%s879_s3 + $0x70] sm:$0xff] %v590_v61  ;;  %v591_v62 = vpop.f32.mrb[30].mxu1 }
 0x233   :  { %v592_v63 = vpop.f32.mrb[31].mxu1 }
 0x234   :  { %v593_v1 = vadd.f32 %v592_v63, %v591_v62 }
 0x236   :  { %507 = vst [vmem:[%s879_s3 + $0x78] sm:$0xff] %v593_v1 }
 0x237   :  { %512 = vsyncpa [#allocation3], 1 }
 0x238   :  { %513 = vsyncpa [#allocation5], 1 }

</bundles_post_ra>
